<compile_context>
chip_gen: v6e
topology: v6e:2x2x1
jax: 0.10.0
libtpu: 0.0.40
codegen_flags: <defaults>
</compile_context>

<pallas_src>
import jax
import jax.numpy as jnp
from jax.experimental import pallas as pl
from jax.experimental.pallas import tpu as pltpu


def _se_kernel(x_ref, w1_ref, b1_ref, w2_ref, b2_ref, o_ref):
    # x_ref: (1, C, HW) in input dtype; weights/biases are f32.
    x = x_ref[...]                                                   # (1, C, HW)
    hw = x_ref.shape[-1]
    inv_hw = jnp.float32(1.0 / hw)                                   # static constant

    # Squeeze: global average pool over spatial dim, accumulate in f32.
    squeeze = jnp.sum(x.astype(jnp.float32), axis=-1) * inv_hw       # (1, C)

    # Excitation: fc1 -> relu -> fc2 -> sigmoid (weights pre-transposed).
    h = jnp.dot(squeeze, w1_ref[...],
                preferred_element_type=jnp.float32) + b1_ref[...]    # (1, Cr)
    h = jnp.maximum(h, 0.0)
    g = jnp.dot(h, w2_ref[...],
                preferred_element_type=jnp.float32) + b2_ref[...]    # (1, C)
    g = jax.nn.sigmoid(g)

    # Scale: broadcast gate over spatial positions, in the input dtype.
    o_ref[...] = x * g.astype(x.dtype)[:, :, None]


@jax.jit
def channel_se_layer(x_nchw, w1, b1, w2, b2):
    """x_nchw: (B, C, H, W); w1: (Cr, C); b1: (Cr,); w2: (C, Cr); b2: (C,)."""
    B, C, H, W = x_nchw.shape
    HW = H * W
    Cr = w1.shape[0]
    dtype = x_nchw.dtype
    itemsize = jnp.dtype(dtype).itemsize

    x = x_nchw.reshape(B, C, HW)

    # Pre-transpose weights once in the wrapper (free vs. per-step in-kernel .T).
    w1_t = jnp.asarray(w1, jnp.float32).T       # (C, Cr)
    w2_t = jnp.asarray(w2, jnp.float32).T       # (Cr, C)
    b1_r = jnp.asarray(b1, jnp.float32).reshape(1, Cr)
    b2_r = jnp.asarray(b2, jnp.float32).reshape(1, C)

    # TODO(synk): for very large C*HW per batch element (early conv stages), a
    # two-pass design (tiled mean reduction kernel + tiled scale kernel) is the
    # shape-robust alternative; this single-pass kernel assumes one (C, HW)
    # slab fits comfortably in VMEM.

    # Budget VMEM explicitly for the chosen block sizes (x + out, double
    # buffered), capped well under v7x's 64 MiB physical VMEM.
    block_bytes = C * HW * itemsize
    vmem_limit = int(min(48 * 1024 * 1024,
                         max(8 * 1024 * 1024, 4 * block_bytes + (1 << 20))))

    cost = pl.CostEstimate(
        flops=2 * B * C * Cr * 2 + 2 * B * C * HW,
        transcendentals=B * C,
        bytes_accessed=2 * B * C * HW * itemsize,
    )

    out = pl.pallas_call(
        _se_kernel,
        out_shape=jax.ShapeDtypeStruct((B, C, HW), dtype),
        grid=(B,),
        in_specs=[
            pl.BlockSpec((1, C, HW), lambda b: (b, 0, 0)),   # x: one batch slab per step
            pl.BlockSpec((C, Cr), lambda b: (0, 0)),         # w1^T: resident
            pl.BlockSpec((1, Cr), lambda b: (0, 0)),         # b1:   resident
            pl.BlockSpec((Cr, C), lambda b: (0, 0)),         # w2^T: resident
            pl.BlockSpec((1, C), lambda b: (0, 0)),          # b2:   resident
        ],
        out_specs=pl.BlockSpec((1, C, HW), lambda b: (b, 0, 0)),
        compiler_params=pltpu.CompilerParams(
            dimension_semantics=("parallel",),
            vmem_limit_bytes=vmem_limit,
        ),
        cost_estimate=cost,
    )(x, w1_t, b1_r, w2_t, b2_r)

    return out.reshape(B, C, H, W)


def _reference(x, w1, b1, w2, b2):
    B, C, H, W = x.shape
    s = x.reshape(B, C, -1).astype(jnp.float32).mean(axis=2)
    h = jax.nn.relu(s @ w1.T.astype(jnp.float32) + b1)
    g = jax.nn.sigmoid(h @ w2.T.astype(jnp.float32) + b2)
    return x * g.astype(x.dtype).reshape(B, C, 1, 1)


if __name__ == "__main__":
    B, C, H, W = 2, 4, 16, 16
    reduction_ratio = 2
    Cr = C // reduction_ratio

    key = jax.random.PRNGKey(0)
    kx, k1, k2, k3, k4 = jax.random.split(key, 5)

    x = jax.random.normal(kx, (B, C, H, W), dtype=jnp.float32)
    # Deterministic synthetic parameters (shapes match nn.Linear in __init__).
    w1 = jax.random.normal(k1, (Cr, C), dtype=jnp.float32) * 0.1
    b1 = jax.random.normal(k2, (Cr,), dtype=jnp.float32) * 0.1
    w2 = jax.random.normal(k3, (C, Cr), dtype=jnp.float32) * 0.1
    b2 = jax.random.normal(k4, (C,), dtype=jnp.float32) * 0.1

    out = channel_se_layer(x, w1, b1, w2, b2)
    out = jax.block_until_ready(out)

    ref = _reference(x, w1, b1, w2, b2)
    assert out.shape == (B, C, H, W)
    assert out.dtype == x.dtype
    assert jnp.allclose(out, ref, atol=1e-5, rtol=1e-5)

    print("KERNEL_OK")
</pallas_src>

<mosaic_0001>
module attributes {stable_mosaic.version = 11 : i64} {
  func.func @_se_kernel(%arg0: i32, %arg1: memref<1x4x256xf32, #tpu.memory_space<vmem>>, %arg2: memref<4x2xf32, #tpu.memory_space<vmem>>, %arg3: memref<1x2xf32, #tpu.memory_space<vmem>>, %arg4: memref<2x4xf32, #tpu.memory_space<vmem>>, %arg5: memref<1x4xf32, #tpu.memory_space<vmem>>, %arg6: memref<1x4x256xf32, #tpu.memory_space<vmem>>) attributes {dimension_semantics = [#tpu.dimension_semantics<parallel>], iteration_bounds = array<i64: 2>, scalar_prefetch = 0 : i64, scratch_operands = 0 : i64, tpu.core_type = #tpu.core_type<tc>, window_params = [{transform_indices = @transform_0, window_bounds = array<i64: 1, 4, 256>}, {pipeline_mode = #tpu.pipeline_mode<synchronous>, transform_indices = @transform_1, window_bounds = array<i64: 4, 2>}, {pipeline_mode = #tpu.pipeline_mode<synchronous>, transform_indices = @transform_2, window_bounds = array<i64: 1, 2>}, {pipeline_mode = #tpu.pipeline_mode<synchronous>, transform_indices = @transform_3, window_bounds = array<i64: 2, 4>}, {pipeline_mode = #tpu.pipeline_mode<synchronous>, transform_indices = @transform_4, window_bounds = array<i64: 1, 4>}, {transform_indices = @transform_5, window_bounds = array<i64: 1, 4, 256>}]} {
    %c0 = arith.constant 0 : index
    %c0_0 = arith.constant 0 : index
    %c0_1 = arith.constant 0 : index
    %0 = vector.load %arg1[%c0, %c0_0, %c0_1] : memref<1x4x256xf32, #tpu.memory_space<vmem>>, vector<1x4x256xf32>
    %cst = arith.constant dense<0.000000e+00> : vector<1x4xf32>
    %1 = vector.multi_reduction <add>, %0, %cst [2] : vector<1x4x256xf32> to vector<1x4xf32>
    %cst_2 = arith.constant 3.906250e-03 : f32
    %2 = vector.broadcast %cst_2 : f32 to vector<1x4xf32>
    %3 = arith.mulf %1, %2 : vector<1x4xf32>
    %c0_3 = arith.constant 0 : index
    %c0_4 = arith.constant 0 : index
    %4 = vector.load %arg2[%c0_3, %c0_4] : memref<4x2xf32, #tpu.memory_space<vmem>>, vector<4x2xf32>
    %cst_5 = arith.constant dense<0.000000e+00> : vector<1x2xf32>
    %5 = tpu.matmul %3, %4, %cst_5 {dimension_numbers = #tpu.dot_dimension_numbers<[1], [0], [0], [1], [0, 0, 1, 1], [], []>} : vector<1x4xf32>, vector<4x2xf32>, vector<1x2xf32> -> vector<1x2xf32>
    %c0_6 = arith.constant 0 : index
    %c0_7 = arith.constant 0 : index
    %6 = vector.load %arg3[%c0_6, %c0_7] : memref<1x2xf32, #tpu.memory_space<vmem>>, vector<1x2xf32>
    %7 = arith.addf %5, %6 : vector<1x2xf32>
    %cst_8 = arith.constant 0.000000e+00 : f32
    %8 = vector.broadcast %cst_8 : f32 to vector<1x2xf32>
    %9 = arith.maximumf %7, %8 : vector<1x2xf32>
    %c0_9 = arith.constant 0 : index
    %c0_10 = arith.constant 0 : index
    %10 = vector.load %arg4[%c0_9, %c0_10] : memref<2x4xf32, #tpu.memory_space<vmem>>, vector<2x4xf32>
    %cst_11 = arith.constant dense<0.000000e+00> : vector<1x4xf32>
    %11 = tpu.matmul %9, %10, %cst_11 {dimension_numbers = #tpu.dot_dimension_numbers<[1], [0], [0], [1], [0, 0, 1, 1], [], []>} : vector<1x2xf32>, vector<2x4xf32>, vector<1x4xf32> -> vector<1x4xf32>
    %c0_12 = arith.constant 0 : index
    %c0_13 = arith.constant 0 : index
    %12 = vector.load %arg5[%c0_12, %c0_13] : memref<1x4xf32, #tpu.memory_space<vmem>>, vector<1x4xf32>
    %13 = arith.addf %11, %12 : vector<1x4xf32>
    %14 = arith.negf %13 : vector<1x4xf32>
    %15 = math.exp %14 : vector<1x4xf32>
    %cst_14 = arith.constant 1.000000e+00 : f32
    %16 = vector.broadcast %cst_14 : f32 to vector<1x4xf32>
    %17 = arith.addf %16, %15 : vector<1x4xf32>
    %18 = arith.divf %16, %17 : vector<1x4xf32>
    %19 = vector.shape_cast %18 : vector<1x4xf32> to vector<1x4x1xf32>
    %20 = vector.broadcast %19 : vector<1x4x1xf32> to vector<1x4x256xf32>
    %21 = arith.mulf %0, %20 : vector<1x4x256xf32>
    %c0_15 = arith.constant 0 : index
    %c0_16 = arith.constant 0 : index
    %c0_17 = arith.constant 0 : index
    %22 = vector.load %arg6[%c0_15, %c0_16, %c0_17] : memref<1x4x256xf32, #tpu.memory_space<vmem>>, vector<1x4x256xf32>
    tpu.vector_store %arg6[%c0_15, %c0_16, %c0_17], %21 {strides = array<i32>} : memref<1x4x256xf32, #tpu.memory_space<vmem>>, vector<1x4x256xf32>,
    return
  }
  func.func @transform_0(%arg0: i32) -> (i32, i32, i32) {
    %c0_i32 = arith.constant 0 : i32
    %c0_i32_0 = arith.constant 0 : i32
    %c0_i32_1 = arith.constant 0 : i32
    return %arg0, %c0_i32, %c0_i32_0 : i32, i32, i32
  }
  func.func @transform_1(%arg0: i32) -> (i32, i32) {
    %c0_i32 = arith.constant 0 : i32
    %c0_i32_0 = arith.constant 0 : i32
    %c0_i32_1 = arith.constant 0 : i32
    return %c0_i32, %c0_i32_0 : i32, i32
  }
  func.func @transform_2(%arg0: i32) -> (i32, i32) {
    %c0_i32 = arith.constant 0 : i32
    %c0_i32_0 = arith.constant 0 : i32
    %c0_i32_1 = arith.constant 0 : i32
    return %c0_i32, %c0_i32_0 : i32, i32
  }
  func.func @transform_3(%arg0: i32) -> (i32, i32) {
    %c0_i32 = arith.constant 0 : i32
    %c0_i32_0 = arith.constant 0 : i32
    %c0_i32_1 = arith.constant 0 : i32
    return %c0_i32, %c0_i32_0 : i32, i32
  }
  func.func @transform_4(%arg0: i32) -> (i32, i32) {
    %c0_i32 = arith.constant 0 : i32
    %c0_i32_0 = arith.constant 0 : i32
    %c0_i32_1 = arith.constant 0 : i32
    return %c0_i32, %c0_i32_0 : i32, i32
  }
  func.func @transform_5(%arg0: i32) -> (i32, i32, i32) {
    %c0_i32 = arith.constant 0 : i32
    %c0_i32_0 = arith.constant 0 : i32
    %c0_i32_1 = arith.constant 0 : i32
    return %arg0, %c0_i32, %c0_i32_0 : i32, i32, i32
  }
}

</mosaic_0001>

<bundles_post_ra>
// kernel: channel_se_layer.1
= control target key start
LH: loop header
LB: loop body
LE: loop exit
PB: predicated region body
PF: predicated region fallthrough
CT: control target
= control target key end

     0   :  { %s570_s18 = smov 0   ;;  %s606_s0 = inlined_call_operand.vmem [shape: f32[2,4,256], index: 0, kind: input, shape index: {}]   ;;  %s607_s1 = inlined_call_operand.vmem [shape: f32[4,2], index: 1, kind: input, shape index: {}]   ;;  %s608_s2 = inlined_call_operand.vmem [shape: f32[1,2], index: 2, kind: input, shape index: {}]   ;;  %s609_s3 = inlined_call_operand.vmem [shape: f32[2,4], index: 3, kind: input, shape index: {}]   ;;  %s610_s4 = inlined_call_operand.vmem [shape: f32[1,4], index: 4, kind: input, shape index: {}]   ;;  %s611_s5 = inlined_call_operand.vmem [shape: f32[2,4,256], index: 5, kind: output, shape index: {}]  }
   0x1 LB: > { %s481_s19 = sadd.s32 4294967295, %s535_s18   ;;  %p485_p0 = scmp.ge.s32.totalorder %s535_s18, 1  ;;  %s535_s18 = sphi %s570_s18, %s15_s18  }
   0x2   : > { %p187_p1 = scmp.lt.s32.totalorder %s535_s18, 3 }
   0x4   : > { %p188_p2 = pnand %p485_p0, %p187_p1 }
   0x5   : > { %p215_p3 = scmp.lt.s32.totalorder (!%p188_p2), %s481_s19, 1 }
   0x6   : > { %191 = sbr.rel (%p188_p2) target bundleno = 708 (0x2c4), region = 40 }
   0xb   : > { %s613_s19 = smov (!%p215_p3, %s481_s19), 1  ;;  %vm229_vm0 = vcmask 1043456   ;;  %v537_v5 = vmov 0.0   ;;  %v236_v6 = vld [vmem:[%s607_s1] sm:$0xf]  ;;  %vm538_vm1 = vmmov 0   ;;  %v239_v7 = vlaneseq }
   0xc   : > { %s497_s20 = sshll.u32 %s613_s19, 3  ;;  %503 = vmatprep.subr.mxu0 %v537_v5  ;;  %508 = vmatprep.subr.mxu1 %v537_v5  ;;  %vm245_vm2 = vcmask 31744   ;;  %v322_v14 = vld [vmem:[%s609_s3] sm:$0x3]  ;;  %vm328_vm3 = vcmask 1041408   ;;  %vm324_vm4 = vcmask 15360  }
   0xd   : > { %s219_s23 = scalar_lea.vmem %s606_s0, %s497_s20  ;;  %504 = vmatpush3.msk.msra.mxu0 %vm229_vm0, %v236_v6  ;;  %505 = vmatprep.mubr.msk.f32.mxu0 %vm538_vm1, %v537_v5  ;;  %v240_v8 = vand.u32 127, %v239_v7  ;;  %v242_v9 = vshrl.u32 %v239_v7, 7  ;;  %v237_v15 = vld [vmem:[%s608_s2] sm:$0x1]  ;;  %v539_v30 = vmov 839922192   ;;  %s224_s9 = scalar_lea.vmem %s611_s5, %s497_s20 }
   0xe   : > { %v225_v0 = vld [vmem:[%s219_s23] sm:$0xff]  ;;  %510 = vmatprep.mubr.msk.f32.mxu1 %vm538_vm1, %v537_v5  ;;  %509 = vmatpush3.msk.msra.mxu1 %vm328_vm3, %v322_v14  ;;  %v417_v31 = vunpack.c.l.s4 %v539_v30 }
   0xf   : > { %v227_v1 = vcombine.high %v225_v0, %v225_v0  ;;  %v230_v2 = vsel %vm229_vm0, %v225_v0, 0.0  ;;  %v243_v10 = vsub.s32 %v240_v8, %v242_v9  ;;  %v323_v20 = vld [vmem:[%s610_s4] sm:$0x1]  ;;  %v410_v27 = vsub.s32 0, %v242_v9 }
  0x10   : > { %v418_v32 = vunpack.c.0.s8 %v417_v31 }
  0x11   : > { %v231_v3 = vsel %vm229_vm0, %v227_v1, 0.0 }
  0x12   : > { %v232_v4 = vadd.f32 %v231_v3, %v230_v2  ;;  %v421_v33 = vsub.s32 %v418_v32, %v242_v9 }
  0x14   : > { %233 = vadd.xlane.f32.xlu0 %v232_v4 }
  0x9d   : > { %v234_v11 = vpop.xlane.xlu0 %233 }
  0x9e   : > { %v235_v12 = vmul.f32 0.00390625, %v234_v11 }
  0xa0   : > { %v244_v13 = vrot.slane %v235_v12, %v243_v10 }
  0xa2   : > { %506 = vmatmul.mubr.msk.f32.vlgmr.msra.gmra.mxu0 %vm245_vm2, %v244_v13 }
 0x162   : > { %v317_v16 = vpop.f32.mrf.mxu0 }
 0x163   : > { %v318_v17 = vadd.f32 %v317_v16, %v237_v15 }
 0x164   : > { %v507_v18 = vpop.f32.mrf.mxu0 }
 0x165   : > { %v321_v19 = vmax.f32 %v318_v17, 0.0 }
 0x167   : > { %511 = vmatmul.mubr.msk.f32.vlgmr.msra.gmra.mxu1 %vm324_vm4, %v321_v19 }
 0x227   : > { %v398_v21 = vpop.f32.mrf.mxu1 }
 0x228   : > { %v399_v22 = vadd.f32 %v398_v21, %v323_v20 }
 0x229   : > { %v512_v23 = vpop.f32.mrf.mxu1 }
 0x22a   : > { %v494_v24 = vmul.f32 -1.442695, %v399_v22 }
 0x22c   : > { %525 = vpow2.f32 %v494_v24 }
 0x239   : > { %v526_v25 = vpop.eup %525 }
 0x23a   : > { %v405_v26 = vadd.f32 1.0, %v526_v25 }
 0x23c   : > { %527 = vrcp.f32 %v405_v26 }
 0x249   : > { %v528_v28 = vpop.eup %527 }
 0x24a   : > { %v411_v29 = vrot.slane %v528_v28, %v410_v27 }
 0x24c   : > { %413 = vbcast.lane.b32.xlu0 %v411_v29, 256 }
 0x2be   : > { %v414_v34 = vpop.permute.xlu0 %413 }
 0x2bf   : > { %v422_v35 = vrot.slane %v414_v34, %v421_v33 }
 0x2c1   : > { %v424_v36 = vmul.f32 %v422_v35, %v225_v0 }
 0x2c3   : > { %425 = vst [vmem:[%s224_s9] sm:$0xff] %v424_v36 }
 0x2c4 PF: > { %s15_s18 = sadd.s32 1, %s535_s18  }
 0x2c5   : > { %p12_p4 = scmp.ge.s32.totalorder %s15_s18, 4  }
 0x2c7   :  { %14 = sbr.rel (!%p12_p4) target bundleno = 1 (0x1), region = 70 }

</bundles_post_ra>
